<compile_context>
chip_gen: v7x
topology: tpu7x:2x2x1
jax: 0.10.0
libtpu: 0.0.40
codegen_flags: <defaults>
</compile_context>

<pallas_src>
import functools

import jax
import jax.numpy as jnp
from jax import lax
from jax.experimental import pallas as pl
from jax.experimental.pallas import tpu as pltpu


# ------------------------- helpers -------------------------

def _round_up(x, m):
    return ((x + m - 1) // m) * m


def _pad_cols(a, target):
    pad = target - a.shape[-1]
    if pad <= 0:
        return a
    return jnp.pad(a, [(0, 0)] * (a.ndim - 1) + [(0, pad)])


def _pad_rows(a, target):
    pad = target - a.shape[0]
    if pad <= 0:
        return a
    return jnp.pad(a, [(0, pad)] + [(0, 0)] * (a.ndim - 1))


# ------------------------- fused Pallas kernel -------------------------

def _student_fused_kernel(x_ref, w1_ref, b1_ref, w2_ref, b2_ref, w3_ref, b3_ref,
                          h1_ref, h2_ref, logits_ref, probs_ref, *, n_classes):
    x = x_ref[...]

    # Layer 0: (QuantStub = identity) -> Linear -> ReLU
    h1 = jnp.dot(x, w1_ref[...], preferred_element_type=jnp.float32) + b1_ref[...]
    h1 = jnp.maximum(h1, 0.0)
    h1_ref[...] = h1.astype(h1_ref.dtype)

    # Layer 1: Linear -> ReLU  (lane-padded output; padded lanes are exactly 0)
    h2 = jnp.dot(h1, w2_ref[...], preferred_element_type=jnp.float32) + b2_ref[...]
    h2 = jnp.maximum(h2, 0.0)
    h2_ref[...] = h2.astype(h2_ref.dtype)

    # Layer 2: Linear (DeQuantStub = identity); lane-padded logits (pad lanes = 0)
    logits = jnp.dot(h2, w3_ref[...], preferred_element_type=jnp.float32) + b3_ref[...]
    logits_ref[...] = logits.astype(logits_ref.dtype)

    # Masked softmax over the first n_classes lanes of the padded tile.
    lane = lax.broadcasted_iota(jnp.int32, logits.shape, dimension=1)
    valid = lane < n_classes
    masked = jnp.where(valid, logits, -jnp.inf)
    m = jnp.max(masked, axis=-1, keepdims=True)
    e = jnp.where(valid, jnp.exp(logits - m), 0.0)
    denom = jnp.sum(e, axis=-1, keepdims=True)
    probs_ref[...] = (e / denom).astype(probs_ref.dtype)


# ------------------------- model wrapper -------------------------

def init_student_params(key, input_dim, n_classes=2, output_dim_list=(256, 64)):
    whole = [input_dim] + list(output_dim_list) + [n_classes]
    params = []
    for i in range(len(whole) - 1):
        din, dout = whole[i], whole[i + 1]
        key, kw, kb = jax.random.split(key, 3)
        bound = 1.0 / jnp.sqrt(din)  # mimic nn.Linear default uniform init
        w = jax.random.uniform(kw, (din, dout), jnp.float32, -bound, bound)
        b = jax.random.uniform(kb, (1, dout), jnp.float32, -bound, bound)
        params.append((w, b))
    return params


def student_forward(params, x):
    """Returns (middle_output_list, y) matching the PyTorch module."""
    (w1, b1), (w2, b2), (w3, b3) = params
    B, D0 = x.shape
    D1, D2, D3 = w1.shape[1], w2.shape[1], w3.shape[1]

    # Lane-pad hidden / class dims to multiples of 128 (zero padding => exact numerics).
    D1p = _round_up(D1, 128)
    D2p = _round_up(D2, 128)
    D3p = _round_up(D3, 128)
    w1p = _pad_cols(w1, D1p)
    b1p = _pad_cols(b1, D1p)
    w2p = _pad_rows(_pad_cols(w2, D2p), D1p)
    b2p = _pad_cols(b2, D2p)
    w3p = _pad_rows(_pad_cols(w3, D3p), D2p)
    b3p = _pad_cols(b3, D3p)

    # Batch tiling: single step at small batch; <=256-row tiles + parallel grid otherwise.
    block_b = max(8, min(256, _round_up(B, 8)))
    Bp = _round_up(B, block_b)
    xp = x if Bp == B else jnp.pad(x, ((0, Bp - B), (0, 0)))
    grid = (Bp // block_b,)

    row_map = lambda i: (i, 0)   # tiles over batch
    rep_map = lambda i: (0, 0)   # weights/biases: whole array, reused every step

    # Blocked specs default to VMEM.
    in_specs = [
        pl.BlockSpec((block_b, D0), row_map),
        pl.BlockSpec((D0, D1p), rep_map),
        pl.BlockSpec((1, D1p), rep_map),
        pl.BlockSpec((D1p, D2p), rep_map),
        pl.BlockSpec((1, D2p), rep_map),
        pl.BlockSpec((D2p, D3p), rep_map),
        pl.BlockSpec((1, D3p), rep_map),
    ]
    out_specs = (
        pl.BlockSpec((block_b, D1p), row_map),
        pl.BlockSpec((block_b, D2p), row_map),
        pl.BlockSpec((block_b, D3p), row_map),
        pl.BlockSpec((block_b, D3p), row_map),
    )
    out_shape = (
        jax.ShapeDtypeStruct((Bp, D1p), jnp.float32),
        jax.ShapeDtypeStruct((Bp, D2p), jnp.float32),
        jax.ShapeDtypeStruct((Bp, D3p), jnp.float32),
        jax.ShapeDtypeStruct((Bp, D3p), jnp.float32),
    )

    h1p, h2p, logits_p, probs_p = pl.pallas_call(
        functools.partial(_student_fused_kernel, n_classes=D3),
        out_shape=out_shape,
        grid=grid,
        in_specs=in_specs,
        out_specs=out_specs,
        compiler_params=pltpu.CompilerParams(
            dimension_semantics=("parallel",)),
    )(xp, w1p, b1p, w2p, b2p, w3p, b3p)

    h1 = h1p[:B, :D1]
    h2 = h2p[:B, :D2]
    logits = logits_p[:B, :D3]
    probs = probs_p[:B, :D3]
    return [h1, h2, logits], probs


student_forward_jit = jax.jit(student_forward)


# ------------------------- reference (plain JAX) -------------------------

def student_forward_ref(params, x):
    middle = []
    h = x
    n = len(params)
    for i, (w, b) in enumerate(params):
        h = h @ w + b
        if i < n - 1:
            h = jnp.maximum(h, 0.0)
        middle.append(h)
    return middle, jax.nn.softmax(h, axis=-1)


# ------------------------- main -------------------------

if __name__ == "__main__":
    key = jax.random.PRNGKey(0)
    k_params, k_x = jax.random.split(key)

    batch = 8
    input_dim = 32
    n_classes = 2
    output_dim_list = [256, 64]

    params = init_student_params(k_params, input_dim, n_classes, output_dim_list)
    x = jax.random.normal(k_x, (batch, input_dim), jnp.float32)

    middle, y = student_forward_jit(params, x)
    jax.block_until_ready(y)
    for m in middle:
        jax.block_until_ready(m)

    # sanity check against pure-JAX reference
    middle_ref, y_ref = student_forward_ref(params, x)
    assert all(
        bool(jnp.allclose(a, b, atol=1e-5, rtol=1e-5))
        for a, b in zip(middle, middle_ref)
    )
    assert bool(jnp.allclose(y, y_ref, atol=1e-5, rtol=1e-5))

    print("KERNEL_OK")
</pallas_src>

<mosaic_0001>
module attributes {stable_mosaic.version = 11 : i64} {
  func.func @_student_fused_kernel(%arg0: i32, %arg1: memref<8x32xf32, #tpu.memory_space<vmem>>, %arg2: memref<32x256xf32, #tpu.memory_space<vmem>>, %arg3: memref<1x256xf32, #tpu.memory_space<vmem>>, %arg4: memref<256x128xf32, #tpu.memory_space<vmem>>, %arg5: memref<1x128xf32, #tpu.memory_space<vmem>>, %arg6: memref<128x128xf32, #tpu.memory_space<vmem>>, %arg7: memref<1x128xf32, #tpu.memory_space<vmem>>, %arg8: memref<8x256xf32, #tpu.memory_space<vmem>>, %arg9: memref<8x128xf32, #tpu.memory_space<vmem>>, %arg10: memref<8x128xf32, #tpu.memory_space<vmem>>, %arg11: memref<8x128xf32, #tpu.memory_space<vmem>>) attributes {dimension_semantics = [#tpu.dimension_semantics<parallel>], iteration_bounds = array<i64: 1>, scalar_prefetch = 0 : i64, scratch_operands = 0 : i64, tpu.core_type = #tpu.core_type<tc>, window_params = [{transform_indices = @transform_0, window_bounds = array<i64: 8, 32>}, {pipeline_mode = #tpu.pipeline_mode<synchronous>, transform_indices = @transform_1, window_bounds = array<i64: 32, 256>}, {pipeline_mode = #tpu.pipeline_mode<synchronous>, transform_indices = @transform_2, window_bounds = array<i64: 1, 256>}, {pipeline_mode = #tpu.pipeline_mode<synchronous>, transform_indices = @transform_3, window_bounds = array<i64: 256, 128>}, {pipeline_mode = #tpu.pipeline_mode<synchronous>, transform_indices = @transform_4, window_bounds = array<i64: 1, 128>}, {pipeline_mode = #tpu.pipeline_mode<synchronous>, transform_indices = @transform_5, window_bounds = array<i64: 128, 128>}, {pipeline_mode = #tpu.pipeline_mode<synchronous>, transform_indices = @transform_6, window_bounds = array<i64: 1, 128>}, {transform_indices = @transform_7, window_bounds = array<i64: 8, 256>}, {transform_indices = @transform_8, window_bounds = array<i64: 8, 128>}, {transform_indices = @transform_9, window_bounds = array<i64: 8, 128>}, {transform_indices = @transform_10, window_bounds = array<i64: 8, 128>}]} {
    %c0 = arith.constant 0 : index
    %c0_0 = arith.constant 0 : index
    %0 = vector.load %arg1[%c0, %c0_0] : memref<8x32xf32, #tpu.memory_space<vmem>>, vector<8x32xf32>
    %c0_1 = arith.constant 0 : index
    %c0_2 = arith.constant 0 : index
    %1 = vector.load %arg2[%c0_1, %c0_2] : memref<32x256xf32, #tpu.memory_space<vmem>>, vector<32x256xf32>
    %cst = arith.constant dense<0.000000e+00> : vector<8x256xf32>
    %2 = tpu.matmul %0, %1, %cst {dimension_numbers = #tpu.dot_dimension_numbers<[1], [0], [0], [1], [0, 0, 1, 1], [], []>} : vector<8x32xf32>, vector<32x256xf32>, vector<8x256xf32> -> vector<8x256xf32>
    %c0_3 = arith.constant 0 : index
    %c0_4 = arith.constant 0 : index
    %3 = vector.load %arg3[%c0_3, %c0_4] : memref<1x256xf32, #tpu.memory_space<vmem>>, vector<1x256xf32>
    %4 = vector.broadcast %3 : vector<1x256xf32> to vector<8x256xf32>
    %5 = arith.addf %2, %4 : vector<8x256xf32>
    %cst_5 = arith.constant 0.000000e+00 : f32
    %6 = vector.broadcast %cst_5 : f32 to vector<8x256xf32>
    %7 = arith.maximumf %5, %6 : vector<8x256xf32>
    %c0_6 = arith.constant 0 : index
    %c0_7 = arith.constant 0 : index
    %8 = vector.load %arg8[%c0_6, %c0_7] : memref<8x256xf32, #tpu.memory_space<vmem>>, vector<8x256xf32>
    tpu.vector_store %arg8[%c0_6, %c0_7], %7 {strides = array<i32>} : memref<8x256xf32, #tpu.memory_space<vmem>>, vector<8x256xf32>,
    %c0_8 = arith.constant 0 : index
    %c0_9 = arith.constant 0 : index
    %9 = vector.load %arg4[%c0_8, %c0_9] : memref<256x128xf32, #tpu.memory_space<vmem>>, vector<256x128xf32>
    %cst_10 = arith.constant dense<0.000000e+00> : vector<8x128xf32>
    %10 = tpu.matmul %7, %9, %cst_10 {dimension_numbers = #tpu.dot_dimension_numbers<[1], [0], [0], [1], [0, 0, 1, 1], [], []>} : vector<8x256xf32>, vector<256x128xf32>, vector<8x128xf32> -> vector<8x128xf32>
    %c0_11 = arith.constant 0 : index
    %c0_12 = arith.constant 0 : index
    %11 = vector.load %arg5[%c0_11, %c0_12] : memref<1x128xf32, #tpu.memory_space<vmem>>, vector<1x128xf32>
    %12 = vector.broadcast %11 : vector<1x128xf32> to vector<8x128xf32>
    %13 = arith.addf %10, %12 : vector<8x128xf32>
    %cst_13 = arith.constant 0.000000e+00 : f32
    %14 = vector.broadcast %cst_13 : f32 to vector<8x128xf32>
    %15 = arith.maximumf %13, %14 : vector<8x128xf32>
    %c0_14 = arith.constant 0 : index
    %c0_15 = arith.constant 0 : index
    %16 = vector.load %arg9[%c0_14, %c0_15] : memref<8x128xf32, #tpu.memory_space<vmem>>, vector<8x128xf32>
    tpu.vector_store %arg9[%c0_14, %c0_15], %15 {strides = array<i32>} : memref<8x128xf32, #tpu.memory_space<vmem>>, vector<8x128xf32>,
    %c0_16 = arith.constant 0 : index
    %c0_17 = arith.constant 0 : index
    %17 = vector.load %arg6[%c0_16, %c0_17] : memref<128x128xf32, #tpu.memory_space<vmem>>, vector<128x128xf32>
    %cst_18 = arith.constant dense<0.000000e+00> : vector<8x128xf32>
    %18 = tpu.matmul %15, %17, %cst_18 {dimension_numbers = #tpu.dot_dimension_numbers<[1], [0], [0], [1], [0, 0, 1, 1], [], []>} : vector<8x128xf32>, vector<128x128xf32>, vector<8x128xf32> -> vector<8x128xf32>
    %c0_19 = arith.constant 0 : index
    %c0_20 = arith.constant 0 : index
    %19 = vector.load %arg7[%c0_19, %c0_20] : memref<1x128xf32, #tpu.memory_space<vmem>>, vector<1x128xf32>
    %20 = vector.broadcast %19 : vector<1x128xf32> to vector<8x128xf32>
    %21 = arith.addf %18, %20 : vector<8x128xf32>
    %c0_21 = arith.constant 0 : index
    %c0_22 = arith.constant 0 : index
    %22 = vector.load %arg10[%c0_21, %c0_22] : memref<8x128xf32, #tpu.memory_space<vmem>>, vector<8x128xf32>
    tpu.vector_store %arg10[%c0_21, %c0_22], %21 {strides = array<i32>} : memref<8x128xf32, #tpu.memory_space<vmem>>, vector<8x128xf32>,
    %23 = tpu.iota {dimensions = array<i32: 1>} : vector<8x128xi32>
    %c2_i32 = arith.constant 2 : i32
    %24 = vector.broadcast %c2_i32 : i32 to vector<8x128xi32>
    %25 = arith.cmpi slt, %23, %24 : vector<8x128xi32>
    %cst_23 = arith.constant 0xFF800000 : f32
    %26 = vector.broadcast %cst_23 : f32 to vector<8x128xf32>
    %27 = arith.select %25, %21, %26 : vector<8x128xi1>, vector<8x128xf32>
    %cst_24 = arith.constant dense<0xFF800000> : vector<8xf32>
    %28 = vector.multi_reduction <maximumf>, %27, %cst_24 [1] : vector<8x128xf32> to vector<8xf32>
    %29 = vector.shape_cast %28 : vector<8xf32> to vector<8x1xf32>
    %30 = vector.broadcast %29 : vector<8x1xf32> to vector<8x128xf32>
    %31 = arith.subf %21, %30 : vector<8x128xf32>
    %32 = math.exp %31 : vector<8x128xf32>
    %cst_25 = arith.constant 0.000000e+00 : f32
    %33 = vector.broadcast %cst_25 : f32 to vector<8x128xf32>
    %34 = arith.select %25, %32, %33 : vector<8x128xi1>, vector<8x128xf32>
    %cst_26 = arith.constant dense<0.000000e+00> : vector<8xf32>
    %35 = vector.multi_reduction <add>, %34, %cst_26 [1] : vector<8x128xf32> to vector<8xf32>
    %36 = vector.shape_cast %35 : vector<8xf32> to vector<8x1xf32>
    %37 = vector.broadcast %36 : vector<8x1xf32> to vector<8x128xf32>
    %38 = arith.divf %34, %37 : vector<8x128xf32>
    %c0_27 = arith.constant 0 : index
    %c0_28 = arith.constant 0 : index
    %39 = vector.load %arg11[%c0_27, %c0_28] : memref<8x128xf32, #tpu.memory_space<vmem>>, vector<8x128xf32>
    tpu.vector_store %arg11[%c0_27, %c0_28], %38 {strides = array<i32>} : memref<8x128xf32, #tpu.memory_space<vmem>>, vector<8x128xf32>,
    return
  }
  func.func @transform_0(%arg0: i32) -> (i32, i32) {
    %c0_i32 = arith.constant 0 : i32
    %c0_i32_0 = arith.constant 0 : i32
    return %arg0, %c0_i32 : i32, i32
  }
  func.func @transform_1(%arg0: i32) -> (i32, i32) {
    %c0_i32 = arith.constant 0 : i32
    %c0_i32_0 = arith.constant 0 : i32
    %c0_i32_1 = arith.constant 0 : i32
    return %c0_i32, %c0_i32_0 : i32, i32
  }
  func.func @transform_2(%arg0: i32) -> (i32, i32) {
    %c0_i32 = arith.constant 0 : i32
    %c0_i32_0 = arith.constant 0 : i32
    %c0_i32_1 = arith.constant 0 : i32
    return %c0_i32, %c0_i32_0 : i32, i32
  }
  func.func @transform_3(%arg0: i32) -> (i32, i32) {
    %c0_i32 = arith.constant 0 : i32
    %c0_i32_0 = arith.constant 0 : i32
    %c0_i32_1 = arith.constant 0 : i32
    return %c0_i32, %c0_i32_0 : i32, i32
  }
  func.func @transform_4(%arg0: i32) -> (i32, i32) {
    %c0_i32 = arith.constant 0 : i32
    %c0_i32_0 = arith.constant 0 : i32
    %c0_i32_1 = arith.constant 0 : i32
    return %c0_i32, %c0_i32_0 : i32, i32
  }
  func.func @transform_5(%arg0: i32) -> (i32, i32) {
    %c0_i32 = arith.constant 0 : i32
    %c0_i32_0 = arith.constant 0 : i32
    %c0_i32_1 = arith.constant 0 : i32
    return %c0_i32, %c0_i32_0 : i32, i32
  }
  func.func @transform_6(%arg0: i32) -> (i32, i32) {
    %c0_i32 = arith.constant 0 : i32
    %c0_i32_0 = arith.constant 0 : i32
    %c0_i32_1 = arith.constant 0 : i32
    return %c0_i32, %c0_i32_0 : i32, i32
  }
  func.func @transform_7(%arg0: i32) -> (i32, i32) {
    %c0_i32 = arith.constant 0 : i32
    %c0_i32_0 = arith.constant 0 : i32
    return %arg0, %c0_i32 : i32, i32
  }
  func.func @transform_8(%arg0: i32) -> (i32, i32) {
    %c0_i32 = arith.constant 0 : i32
    %c0_i32_0 = arith.constant 0 : i32
    return %arg0, %c0_i32 : i32, i32
  }
  func.func @transform_9(%arg0: i32) -> (i32, i32) {
    %c0_i32 = arith.constant 0 : i32
    %c0_i32_0 = arith.constant 0 : i32
    return %arg0, %c0_i32 : i32, i32
  }
  func.func @transform_10(%arg0: i32) -> (i32, i32) {
    %c0_i32 = arith.constant 0 : i32
    %c0_i32_0 = arith.constant 0 : i32
    return %arg0, %c0_i32 : i32, i32
  }
}

</mosaic_0001>

<bundles_post_ra>
// kernel: student_forward.1
= control target key start
LH: loop header
LB: loop body
LE: loop exit
PB: predicated region body
PF: predicated region fallthrough
CT: control target
= control target key end

     0   :  { %16 = vsyncpa [#allocation3], 0  ;;  %v599_v7 = vmov 0.0   ;;  %vm53_vm0 = vcmask 261120   ;;  %s871_s0 = inlined_call_operand.vmem [shape: f32[8,32], index: 0, kind: input, shape index: {}]   ;;  %s872_s1 = inlined_call_operand.vmem [shape: f32[32,256], index: 1, kind: input, shape index: {}]   ;;  %s873_s2 = inlined_call_operand.vmem [shape: f32[1,256], index: 2, kind: input, shape index: {}]   ;;  %s874_s3 = inlined_call_operand.vmem [shape: f32[256,128], index: 3, kind: input, shape index: {}]   ;;  %s875_s4 = inlined_call_operand.vmem [shape: f32[1,128], index: 4, kind: input, shape index: {}]   ;;  %s876_s5 = inlined_call_operand.vmem [shape: f32[128,128], index: 5, kind: input, shape index: {}]   ;;  %s877_s6 = inlined_call_operand.vmem [shape: f32[1,128], index: 6, kind: input, shape index: {}]   ;;  %s878_s7 = inlined_call_operand.hbm [shape: f32[8,256], index: 7, kind: output, shape index: {0}]   ;;  %s879_s8 = inlined_call_operand.hbm [shape: f32[8,128], index: 8, kind: output, shape index: {1}]   ;;  %s880_s9 = inlined_call_operand.vmem [shape: f32[8,128], index: 9, kind: output, shape index: {2}]   ;;  %s881_s10 = inlined_call_operand.vmem [shape: f32[8,128], index: 10, kind: output, shape index: {3}]  }
   0x1   :  { %v34_v0 = vld [vmem:[%s872_s1 + $0x8] sm:$0xff]  ;;  %v36_v1 = vld [vmem:[%s872_s1 + $0x18] sm:$0xff]  ;;  %v33_v2 = vld [vmem:[%s872_s1] sm:$0xff]  ;;  %121 = vmatprep.mubr.f32.mxu0 %v599_v7 }
   0x2   :  { %v478_v3 = vpack.c.bf16 %v36_v1, %v34_v0  ;;  %v35_v4 = vld [vmem:[%s872_s1 + $0x10] sm:$0xff]  ;;  %v38_v5 = vld [vmem:[%s872_s1 + $0x28] sm:$0xff]  ;;  %v40_v6 = vld [vmem:[%s872_s1 + $0x38] sm:$0xff] }
   0x3   :  { %v480_v8 = vpack.c.bf16 %v35_v4, %v33_v2  ;;  %v482_v9 = vpack.c.bf16 %v40_v6, %v38_v5  ;;  %v37_v10 = vld [vmem:[%s872_s1 + $0x20] sm:$0xff]  ;;  %v39_v11 = vld [vmem:[%s872_s1 + $0x30] sm:$0xff]  ;;  %v149_v13 = vld [vmem:[%s874_s3 + $0x88] sm:$0xff] }
   0x4   :  { %479 = vmatprep.subr.bf16.mxu0 %v478_v3  ;;  %v148_v12 = vld [vmem:[%s874_s3 + $0x80] sm:$0xff]  ;;  %v484_v15 = vpack.c.bf16 %v39_v11, %v37_v10  ;;  %v133_v17 = vld [vmem:[%s874_s3 + $0x8] sm:$0xff]  ;;  %v150_v18 = vld [vmem:[%s874_s3 + $0x90] sm:$0xff] }
   0x5   :  { %v132_v14 = vld [vmem:[%s874_s3] sm:$0xff]  ;;  %481 = vmatpush1.bf16.msra.mxu0 %v480_v8  ;;  %v486_v16 = vpack.c.bf16 %v149_v13, %v148_v12  ;;  %v151_v19 = vld [vmem:[%s874_s3 + $0x98] sm:$0xff]  ;;  %v134_v22 = vld [vmem:[%s874_s3 + $0x10] sm:$0xff] }
   0x6   :  { %483 = vmatprep.subr.bf16.mxu0 %v482_v9  ;;  %v488_v20 = vpack.c.bf16 %v133_v17, %v132_v14  ;;  %v490_v21 = vpack.c.bf16 %v151_v19, %v150_v18  ;;  %v135_v23 = vld [vmem:[%s874_s3 + $0x18] sm:$0xff]  ;;  %v152_v24 = vld [vmem:[%s874_s3 + $0xa0] sm:$0xff]  ;;  %v153_v25 = vld [vmem:[%s874_s3 + $0xa8] sm:$0xff] }
   0x7   :  { %487 = vmatprep.subr.bf16.mxu1 %v486_v16  ;;  %v492_v26 = vpack.c.bf16 %v135_v23, %v134_v22  ;;  %v32_v27 = vld [vmem:[%s871_s0] sm:$0xff]  ;;  %v494_v28 = vpack.c.bf16 %v153_v25, %v152_v24  ;;  %v137_v30 = vld [vmem:[%s874_s3 + $0x28] sm:$0xff]  ;;  %v154_v31 = vld [vmem:[%s874_s3 + $0xb0] sm:$0xff] }
   0x8   :  { %489 = vmatpush3.bf16.msra.mxu1 %v488_v20  ;;  %v136_v29 = vld [vmem:[%s874_s3 + $0x20] sm:$0xff]  ;;  %v155_v32 = vld [vmem:[%s874_s3 + $0xb8] sm:$0xff]  ;;  %v138_v35 = vld [vmem:[%s874_s3 + $0x30] sm:$0xff] }
   0x9   :  { %485 = vmatpush1.bf16.msra.mxu0 %v484_v15  ;;  %491 = vmatprep.subr.bf16.mxu1 %v490_v21  ;;  %v496_v33 = vpack.c.bf16 %v137_v30, %v136_v29  ;;  %v498_v34 = vpack.c.bf16 %v155_v32, %v154_v31  ;;  %v139_v36 = vld [vmem:[%s874_s3 + $0x38] sm:$0xff] }
   0xc   :  { %388 = vmatmul.mubr.msk.f32.vlgmr.msra.gmra.mrb[0].mxu0 %vm53_vm0, %v32_v27  ;;  %493 = vmatpush3.bf16.msra.mxu1 %v492_v26 }
   0xd   :  { %495 = vmatprep.subr.bf16.mxu1 %v494_v28 }
   0xe   :  { %17 = vsyncpa [#allocation5], 0  ;;  %v156_v37 = vld [vmem:[%s874_s3 + $0xc0] sm:$0xff]  ;;  %v157_v38 = vld [vmem:[%s874_s3 + $0xc8] sm:$0xff]  ;;  %v500_v39 = vpack.c.bf16 %v139_v36, %v138_v35  ;;  %v600_v1 = vmov 0.0|0.0   ;;  %v43_v18 = vlaneseq  ;;  %vm601_vm1 = vmmov 0  }
   0xf   :  { %v502_v40 = vpack.c.bf16 %v157_v38, %v156_v37  ;;  %v140_v41 = vld [vmem:[%s874_s3 + $0x40] sm:$0xff]  ;;  %v141_v42 = vld [vmem:[%s874_s3 + $0x48] sm:$0xff]  ;;  %v158_v43 = vld [vmem:[%s874_s3 + $0xd0] sm:$0xff]  ;;  %518 = vmatprep.subr.bf16.mxu0 %v600_v1  ;;  %475 = vmatprep.mubr.msk.f32.mxu0 %vm601_vm1, %v599_v7 }
  0x10   :  { %497 = vmatpush3.bf16.msra.mxu1 %v496_v33  ;;  %v159_v44 = vld [vmem:[%s874_s3 + $0xd8] sm:$0xff]  ;;  %v504_v45 = vpack.c.bf16 %v141_v42, %v140_v41  ;;  %v142_v47 = vld [vmem:[%s874_s3 + $0x50] sm:$0xff]  ;;  %v160_v49 = vld [vmem:[%s874_s3 + $0xe0] sm:$0xff]  ;;  %v44_v19 = vshrl.u32 %v43_v18, 7 }
  0x11   :  { %499 = vmatprep.subr.bf16.mxu1 %v498_v34  ;;  %v506_v46 = vpack.c.bf16 %v159_v44, %v158_v43  ;;  %v143_v48 = vld [vmem:[%s874_s3 + $0x58] sm:$0xff]  ;;  %v161_v50 = vld [vmem:[%s874_s3 + $0xe8] sm:$0xff]  ;;  %v144_v53 = vld [vmem:[%s874_s3 + $0x60] sm:$0xff]  ;;  %v338_v43 = vand.u32 127, %v43_v18 }
  0x12   :  { %v508_v51 = vpack.c.bf16 %v143_v48, %v142_v47  ;;  %v510_v52 = vpack.c.bf16 %v161_v50, %v160_v49  ;;  %v145_v54 = vld [vmem:[%s874_s3 + $0x68] sm:$0xff]  ;;  %v162_v56 = vld [vmem:[%s874_s3 + $0xf0] sm:$0xff]  ;;  %v163_v57 = vld [vmem:[%s874_s3 + $0xf8] sm:$0xff]  ;;  %v45_v20 = vsub.s32 0, %v44_v19  ;;  %v49_v22 = vsub.s32 1, %v44_v19 }
  0x13   :  { %v512_v55 = vpack.c.bf16 %v145_v54, %v144_v53  ;;  %v514_v58 = vpack.c.bf16 %v163_v57, %v162_v56  ;;  %v146_v59 = vld [vmem:[%s874_s3 + $0x70] sm:$0xff]  ;;  %v147_v60 = vld [vmem:[%s874_s3 + $0x78] sm:$0xff]  ;;  %v243_v62 = vld [vmem:[%s876_s5] sm:$0xff]  ;;  %vm339_vm2 = vcmp.lt.s32.totalorder %v338_v43, 2 }
  0x14   :  { %501 = vmatpush3.bf16.msra.mxu1 %v500_v39  ;;  %v516_v61 = vpack.c.bf16 %v147_v60, %v146_v59  ;;  %v244_v63 = vld [vmem:[%s876_s5 + $0x8] sm:$0xff]  ;;  %v245_v0 = vld [vmem:[%s876_s5 + $0x10] sm:$0xff]  ;;  %v246_v3 = vld [vmem:[%s876_s5 + $0x18] sm:$0xff] }
  0x15   :  { %503 = vmatprep.subr.bf16.mxu1 %v502_v40  ;;  %v519_v2 = vpack.c.bf16 %v244_v63, %v243_v62  ;;  %v522_v4 = vpack.c.bf16 %v246_v3, %v245_v0  ;;  %v247_v5 = vld [vmem:[%s876_s5 + $0x20] sm:$0xff]  ;;  %v248_v6 = vld [vmem:[%s876_s5 + $0x28] sm:$0xff]  ;;  %v249_v9 = vld [vmem:[%s876_s5 + $0x30] sm:$0xff] }
  0x16   :  { %v525_v8 = vpack.c.bf16 %v248_v6, %v247_v5  ;;  %v250_v10 = vld [vmem:[%s876_s5 + $0x38] sm:$0xff]  ;;  %v251_v12 = vld [vmem:[%s876_s5 + $0x40] sm:$0xff]  ;;  %v252_v13 = vld [vmem:[%s876_s5 + $0x48] sm:$0xff] }
  0x17   :  { %520 = vmatpush3.bf16.msra.mxu0 %v519_v2  ;;  %v528_v11 = vpack.c.bf16 %v250_v10, %v249_v9  ;;  %v531_v14 = vpack.c.bf16 %v252_v13, %v251_v12  ;;  %v253_v15 = vld [vmem:[%s876_s5 + $0x50] sm:$0xff]  ;;  %v254_v16 = vld [vmem:[%s876_s5 + $0x58] sm:$0xff]  ;;  %v41_v21 = vld [vmem:[%s873_s2] sm:$0x3] }
  0x18   :  { %505 = vmatpush3.bf16.msra.mxu1 %v504_v45  ;;  %521 = vmatprep.subr.bf16.mxu0 %v600_v1  ;;  %v534_v17 = vpack.c.bf16 %v254_v16, %v253_v15  ;;  %v46_v23 = vrot.slane %v41_v21, %v45_v20  ;;  %v50_v24 = vrot.slane %v41_v21, %v49_v22  ;;  %v255_v31 = vld [vmem:[%s876_s5 + $0x60] sm:$0xff]  ;;  %v256_v32 = vld [vmem:[%s876_s5 + $0x68] sm:$0xff]  ;;  %v257_v34 = vld [vmem:[%s876_s5 + $0x70] sm:$0xff] }
  0x19   :  { %507 = vmatprep.subr.bf16.mxu1 %v506_v46  ;;  %v537_v33 = vpack.c.bf16 %v256_v32, %v255_v31  ;;  %v258_v35 = vld [vmem:[%s876_s5 + $0x78] sm:$0xff]  ;;  %v389_v38 = vld [vmem:[%s875_s4] ss:$0 sm:$0xff]  ;;  %s602_s4 = smov [#allocation2]  }
  0x1a   :  { %v540_v36 = vpack.c.bf16 %v258_v35, %v257_v34  ;;  %v390_v44 = vld [vmem:[%s877_s6] ss:$0 sm:$0xff]  ;;  %s358_s22 = sshll.u32 %s602_s4, 4  ;;  %s603_s6 = smov [#allocation4]   ;;  %s359_s22 = int_to_ptr.vmem [resolvable:$true] %s358_s22 }
  0x1b   :  { %523 = vmatpush3.bf16.msra.mxu0 %v522_v4  ;;  %s368_s23 = sshll.u32 %s603_s6, 4  ;;  %s551_s24 = scalar_lea.vmem %s359_s22, 256  ;;  %s369_s23 = int_to_ptr.vmem [resolvable:$true] %s368_s23 }
  0x1c   :  { %509 = vmatpush3.bf16.msra.mxu1 %v508_v51  ;;  %524 = vmatprep.subr.bf16.mxu0 %v600_v1  ;;  %p552_p0 = scmp.ne.s32.totalorder %s359_s22, %s551_s24  ;;  %p556_p1 = scmp.lt.s32.totalorder %s359_s22, %s359_s22 }
  0x1d   :  { %511 = vmatprep.subr.bf16.mxu1 %v510_v52  ;;  %p557_p2 = scmp.lt.s32.totalorder %s551_s24, %s551_s24 }
  0x1f   :  { %526 = vmatpush3.bf16.msra.mxu0 %v525_v8  ;;  %p558_p3 = por %p557_p2, %p556_p1 }
  0x20   :  { %513 = vmatpush3.bf16.msra.mxu1 %v512_v55  ;;  %527 = vmatprep.subr.bf16.mxu0 %v600_v1 }
  0x21   :  { %515 = vmatprep.subr.bf16.mxu1 %v514_v58  ;;  %p559_p4 = pnand %p558_p3, %p552_p0 }
  0x23   :  { %529 = vmatpush3.bf16.msra.mxu0 %v528_v11 }
  0x24   :  { %517 = vmatpush3.bf16.msra.mxu1 %v516_v61  ;;  %530 = vmatprep.subr.bf16.mxu0 %v600_v1 }
  0x27   :  { %532 = vmatpush3.bf16.msra.mxu0 %v531_v14 }
  0x28   :  { %533 = vmatprep.subr.bf16.mxu0 %v600_v1 }
  0x2b   :  { %535 = vmatpush3.bf16.msra.mxu0 %v534_v17 }
  0x2c   :  { %536 = vmatprep.subr.bf16.mxu0 %v600_v1 }
  0x2f   :  { %538 = vmatpush3.bf16.msra.mxu0 %v537_v33 }
  0x30   :  { %539 = vmatprep.subr.bf16.mxu0 %v600_v1 }
  0x33   :  { %541 = vmatpush3.bf16.msra.mxu0 %v540_v36 }
  0xdf   :  { %v123_v25 = vpop.f32.mrb[0].mxu0 }
  0xe0   :  { %v124_v26 = vadd.f32 %v123_v25, %v46_v23  ;;  %v125_v27 = vpop.f32.mrb[1].mxu0 }
  0xe1   :  { %v126_v28 = vadd.f32 %v125_v27, %v50_v24 }
  0xe2   :  { %v128_v29 = vmax.f32 %v124_v26, 0.0 }
  0xe3   :  { %v129_v30 = vmax.f32 %v126_v28, 0.0 }
  0xe4   :  { %130 = vst [vmem:[#allocation2] sm:$0xff] %v128_v29 }
  0xe5   :  { %131 = vst [vmem:[#allocation2 + $0x8] sm:$0xff] %v129_v30  ;;  %235 = vmatprep.mubr.f32.mxu1 %v129_v30 }
  0xe6   :  { %236 = vmatmul.mubr.f32.vlgmr.msra.gmra.mrb[0].mxu1 %v128_v29 }
 0x1b9   :  { %v423_v37 = vpop.f32.mrb[0].mxu1 }
 0x1ba   :  { %v424_v39 = vpop.f32.mrb[1].mxu1 }
 0x1bb   :  { %v425_v40 = vadd.f32 %v424_v39, %v423_v37 }
 0x1bd   :  { %v238_v41 = vadd.f32 %v425_v40, %v389_v38 }
 0x1bf   :  { %v241_v42 = vmax.f32 %v238_v41, 0.0 }
 0x1c1   :  { %242 = vst [vmem:[#allocation4] sm:$0xff] %v241_v42  ;;  %476 = vmatmul.mubr.f32.vlgmr.msra.gmra.mrb[2].mxu0 %v241_v42 }
 0x294   :  { %v332_v45 = vpop.f32.mrb[2].mxu0 }
 0x295   :  { %v333_v46 = vadd.f32 %v390_v44, %v332_v45  ;;  %v477_v7 = vpop.f32.mrb[3].mxu0 }
 0x297   :  { %336 = vst [vmem:[%s880_s9] sm:$0xff] %v333_v46  ;;  %v340_v47 = vsel %vm339_vm2, %v333_v46, -inf }
 0x298   :  { %341 = vmax.xlane.f32.xlu0 %v340_v47 }
 0x325   :  { %v342_v48 = vpop.xlane.xlu0 %341 }
 0x326   :  { %v343_v49 = vsub.f32 %v333_v46, %v342_v48 }
 0x328   :  { %v344_v50 = vmul.f32 1.442695, %v343_v49 }
 0x32a   :  { %547 = vpow2.f32 %v344_v50 }
 0x334   :  { %v548_v51 = vpop.eup %547 }
 0x335   :  { %v346_v52 = vsel %vm339_vm2, %v548_v51, 0.0 }
 0x336   :  { %347 = vadd.xlane.f32.xlu0 %v346_v52 }
 0x337   :  { %562 = shalt.err (!%p559_p4)
}
 0x338   :  { %s563_s26 = scalar_lea.hbm %s878_s7, 256 }
 0x339   :  { %p564_p5 = scmp.ne.s32.totalorder %s878_s7, %s563_s26  ;;  %p567_p6 = scmp.lt.u32.totalorder %s563_s26, %s878_s7 }
 0x33b   :  { %p569_p7 = pnand %p567_p6, %p564_p5 }
 0x33d   :  { %572 = shalt.err (!%p569_p7)
}
 0x33e   :  { %361 = dma.vmem_to_hbm [thread:$0]  %s359_s22, 256, %s878_s7, [#allocation3]  }
 0x33f   :  { %s573_s13 = scalar_lea.vmem %s369_s23, 128  ;;  %p578_p9 = scmp.lt.s32.totalorder %s369_s23, %s369_s23 }
 0x340   :  { %p574_p8 = scmp.ne.s32.totalorder %s369_s23, %s573_s13  ;;  %p579_p10 = scmp.lt.s32.totalorder %s573_s13, %s573_s13 }
 0x342   :  { %p580_p11 = por %p579_p10, %p578_p9 }
 0x344   :  { %p581_p12 = pnand %p580_p11, %p574_p8 }
 0x346   :  { %584 = shalt.err (!%p581_p12)
}
 0x347   :  { %s585_s16 = scalar_lea.hbm %s879_s8, 128 }
 0x348   :  { %p586_p13 = scmp.ne.s32.totalorder %s879_s8, %s585_s16  ;;  %p589_p0 = scmp.lt.u32.totalorder %s585_s16, %s879_s8 }
 0x34a   :  { %p591_p1 = pnand %p589_p0, %p586_p13 }
 0x34c   :  { %594 = shalt.err (!%p591_p1)
}
 0x34d   :  { %371 = dma.vmem_to_hbm [thread:$0]  %s369_s23, 128, %s879_s8, [#allocation5]  }
 0x3c3   :  { %v348_v53 = vpop.xlane.xlu0 %347 }
 0x3c4   :  { %549 = vrcp.f32 %v348_v53 }
 0x3ce   :  { %v550_v54 = vpop.eup %549 }
 0x3cf   :  { %v350_v55 = vmul.f32 %v550_v54, %v346_v52 }
 0x3d1   :  { %351 = vst [vmem:[%s881_s10] sm:$0xff] %v350_v55 }
 0x3d2   :  { %595 = dma.done.wait [#allocation3], 256  }
 0x3d3   :  { %596 = vsyncadd [#allocation3], 4294967040 }
 0x3d4   :  { %597 = dma.done.wait [#allocation5], 128  }
 0x3d5   :  { %598 = vsyncadd [#allocation5], 4294967168 }
 0x3d6   :  { %386 = vsyncpa [#allocation3], 1 }
 0x3d7   :  { %387 = vsyncpa [#allocation5], 1 }

</bundles_post_ra>
